<compile_context>
chip_gen: v5e
topology: v5e:2x2
jax: 0.10.0
libtpu: 0.0.40
codegen_flags: <defaults>
</compile_context>

<pallas_src>
from typing import NamedTuple

import jax
import jax.numpy as jnp
from jax.experimental import pallas as pl
from jax.experimental.pallas import tpu as pltpu


_MIB = 1024 * 1024
_MXU_MODE_UNROLL_CAP = 64        # max modes per grid step on the MXU path (unroll bound)
_VPU_LANE_CAP = 2048             # max mode-lanes per grid step on the VPU path
_VPU_BLOCK_CAP_BYTES = 2 * _MIB  # keep VPU accumulators / temporaries modest

_BUDGETS = None


def _round_up(n, m):
    return ((n + m - 1) // m) * m


def _cdiv(a, b):
    return (a + b - 1) // b


def _budgets():
    """(vmem_limit_bytes, per-block byte budget), TPU-generation aware."""
    global _BUDGETS
    if _BUDGETS is None:
        vmem_phys = None
        try:
            vmem_phys = getattr(pltpu.get_tpu_info(), "vmem_capacity_bytes", None)
        except Exception:
            vmem_phys = None
        if vmem_phys is not None and vmem_phys >= 96 * _MIB:
            # v5e / v6e: 128 MiB physical VMEM -> big tiles, fewer ~0.35us grid steps.
            _BUDGETS = (96 * _MIB, 24 * _MIB)
        else:
            # v7x (64 MiB physical / 32 MiB scoped default) or unknown: conservative.
            _BUDGETS = (32 * _MIB, 10 * _MIB)
    return _BUDGETS


# ----------------------------------------------------------------------------
# Weight preparation (hoist / cache the repack outside the forward pass).
# ----------------------------------------------------------------------------
class PreparedSpectralWeights(NamedTuple):
    path: str          # "mxu" | "vpu"
    w: jax.Array       # packed weights for that path


def prepare_vpu_weights(w_real, w_imag):
    """(Cin, Cout, M) x2 -> (2, Cin, Cout, M) f32 ([real|imag] packed on axis 0)."""
    return jnp.stack([w_real, w_imag]).astype(jnp.float32)


def prepare_mxu_weights(w_real, w_imag, compute_dtype=jnp.bfloat16):
    """Stacked-complex, transposed, mode-major weight for the MXU path.

    Returns (M, 2*Cout, 2*Cin) with per-mode block structure
        [[Wr^T, -Wi^T],
         [Wi^T,  Wr^T]]
    so that  W_stack^T[m] @ [xr^T; xi^T] = [real^T; imag^T]  (one real matmul
    per mode).  Cast to `compute_dtype` (bf16 default: native MXU dtype, half
    the HBM/VMEM bytes on the dominant W stream; accumulation stays f32).
    """
    wr = jnp.transpose(w_real, (2, 1, 0))               # (M, Cout, Cin) = Wr^T per mode
    wi = jnp.transpose(w_imag, (2, 1, 0))
    top = jnp.concatenate([wr, -wi], axis=2)            # (M, Cout, 2*Cin)
    bot = jnp.concatenate([wi, wr], axis=2)             # (M, Cout, 2*Cin)
    return jnp.concatenate([top, bot], axis=1).astype(compute_dtype)


def prepare_spectral_weights(w_real, w_imag, *, force_path=None, mxu_threshold=32,
                             mxu_dtype=jnp.bfloat16):
    """Pack the spectral weights once, outside the per-step forward pass."""
    Cin, Cout, _ = w_real.shape
    use_mxu = max(Cin, Cout) >= mxu_threshold
    if force_path == "mxu":
        use_mxu = True
    elif force_path == "vpu":
        use_mxu = False
    if use_mxu:
        return PreparedSpectralWeights("mxu", prepare_mxu_weights(w_real, w_imag, mxu_dtype))
    return PreparedSpectralWeights("vpu", prepare_vpu_weights(w_real, w_imag))


# ----------------------------------------------------------------------------
# Path 1: VPU, modes on the lane axis (small channel counts).  f32 everywhere
# (v5e has no bf16 VALU).
# ----------------------------------------------------------------------------
def _vpu_mix_kernel(x_ref, w_ref, o_ref):
    """x_ref: (2, B, Cin, Tm)  w_ref: (2, Cin, Cout, Tm)  o_ref: (2, B, Cout, Tm).

    Leading axis packs [real, imag] (one DMA stream per operand).  Cin is small
    on this path, so the contraction is a fully unrolled VPU broadcast-MAC.
    """
    xr = x_ref[0]
    xi = x_ref[1]
    wr = w_ref[0]
    wi = w_ref[1]

    b, cin, tm = xr.shape
    cout = wr.shape[1]

    acc_r = jnp.zeros((b, cout, tm), jnp.float32)
    acc_i = jnp.zeros((b, cout, tm), jnp.float32)
    for i in range(cin):                       # unrolled: Cin is small here
        xri = xr[:, i, :][:, None, :]          # (B, 1, Tm)
        xii = xi[:, i, :][:, None, :]
        wri = wr[i][None, :, :]                # (1, Cout, Tm)
        wii = wi[i][None, :, :]
        acc_r = acc_r + xri * wri - xii * wii
        acc_i = acc_i + xri * wii + xii * wri

    o_ref[0] = acc_r
    o_ref[1] = acc_i


def _vpu_mode_tiles(B, Cin, Cout, M, block_budget):
    """Lane (mode) tile for the VPU path: multiple of 128 or full-extent."""
    block_budget = min(block_budget, _VPU_BLOCK_CAP_BYTES)
    per_mode = 4 * 2 * (B * Cin + Cin * Cout + B * Cout)
    tm_cap = min(_VPU_LANE_CAP, max(128, (block_budget // per_mode) // 128 * 128))
    if M <= tm_cap:
        return M, M                     # single full-extent block, zero padding
    nsteps = max(_cdiv(M, tm_cap), 2)   # balanced tiles; >=2 steps (v7x 2-TC)
    tm = _round_up(_cdiv(M, nsteps), 128)
    mp = _round_up(M, tm)
    return tm, mp


def _mix_vpu(xr, xi, w_vpu):
    """xr, xi: (B, Cin, M) f32;  w_vpu: (2, Cin, Cout, M) f32 -> (B, Cout, M) x 2."""
    B, Cin, M = xr.shape
    Cout = w_vpu.shape[2]
    vmem_limit, block_budget = _budgets()

    x = jnp.stack([xr, xi])                                   # (2, B, Cin, M)
    w = w_vpu

    tm, mp = _vpu_mode_tiles(B, Cin, Cout, M, block_budget)
    if mp > M:
        x = jnp.pad(x, ((0, 0), (0, 0), (0, 0), (0, mp - M)))
        w = jnp.pad(w, ((0, 0), (0, 0), (0, 0), (0, mp - M)))

    out = pl.pallas_call(
        _vpu_mix_kernel,
        out_shape=jax.ShapeDtypeStruct((2, B, Cout, mp), jnp.float32),
        grid=(mp // tm,),
        in_specs=[
            pl.BlockSpec((2, B, Cin, tm), lambda m: (0, 0, 0, m)),
            pl.BlockSpec((2, Cin, Cout, tm), lambda m: (0, 0, 0, m)),
        ],
        out_specs=pl.BlockSpec((2, B, Cout, tm), lambda m: (0, 0, 0, m)),
        compiler_params=pltpu.CompilerParams(
            dimension_semantics=("parallel",),
            vmem_limit_bytes=vmem_limit,
        ),
    )(x, w)

    return out[0, :, :, :M], out[1, :, :, :M]


# ----------------------------------------------------------------------------
# Path 2: MXU, one stacked real matmul per mode (large channel counts).
# ----------------------------------------------------------------------------
def _mxu_mix_kernel(w_ref, x_ref, o_ref):
    """w_ref: (Tm, 2*Cout, 2*Cin)  x_ref: (Tm, 2*Cin, B)  o_ref: (Tm, 2*Cout, B).

    Transposed per-mode product: the large W operand (2*Cout rows) streams
    through the MXU, the small activation block (2*Cin x B) is the latched
    operand.  bf16 x bf16 -> f32 accumulation.
    """
    tm = w_ref.shape[0]
    for m in range(tm):                 # static unroll; tm <= _MXU_MODE_UNROLL_CAP
        o_ref[m] = jnp.dot(w_ref[m], x_ref[m],
                           preferred_element_type=jnp.float32)


def _mxu_mode_tiles(M, per_mode_bytes, block_budget):
    """Balanced mode tiling: >=2 grid steps (v7x 2-TC), prefer an exact divisor
    of M (no zero-mode padding), cap the per-step unroll."""
    tm_cap = max(1, min(_MXU_MODE_UNROLL_CAP, block_budget // per_mode_bytes))
    nsteps = _cdiv(M, tm_cap)
    if M >= 2:
        nsteps = max(nsteps, 2)
    for cand in range(nsteps, min(M, nsteps + 8) + 1):
        if M % cand == 0:
            nsteps = cand
            break
    tm = _cdiv(M, nsteps)
    mp = tm * nsteps
    return tm, mp, nsteps


def _mix_mxu(xr, xi, w_mxu):
    """xr, xi: (B, Cin, M) f32;  w_mxu: (M, 2*Cout, 2*Cin) (bf16 by default).

    Returns real & imag outputs, each (B, Cout, M) f32.
    """
    B, Cin, M = xr.shape
    two_ci = 2 * Cin
    two_co = w_mxu.shape[1]
    Cout = two_co // 2
    assert w_mxu.shape == (M, two_co, two_ci), w_mxu.shape

    compute_dtype = w_mxu.dtype
    vmem_limit, block_budget = _budgets()

    # Mode-major packed activations X^T = [xr; xi] -> (M, 2*Cin, B).
    x = jnp.transpose(jnp.concatenate([xr, xi], axis=1), (2, 1, 0)).astype(compute_dtype)

    itemsize = jnp.dtype(compute_dtype).itemsize
    per_mode = itemsize * (two_co * two_ci + two_ci * B) + 4 * two_co * B
    tm, mp, nsteps = _mxu_mode_tiles(M, per_mode, block_budget)

    w = w_mxu
    if mp > M:  # rare with the divisor-friendly tiling above
        x = jnp.pad(x, ((0, mp - M), (0, 0), (0, 0)))
        w = jnp.pad(w, ((0, mp - M), (0, 0), (0, 0)))

    # No 128-lane zero padding of channel dims: blocks are full-extent in the
    # last two dims, so the (8,128) rule is satisfied and W HBM traffic stays
    # at its natural size.
    # TODO(synk): if xprof shows exposed DMA on the W stream, add
    # pipeline_mode=pl.Buffered(3) to the W BlockSpec (check v7x VMEM headroom).
    out = pl.pallas_call(
        _mxu_mix_kernel,
        out_shape=jax.ShapeDtypeStruct((mp, two_co, B), jnp.float32),
        grid=(nsteps,),
        in_specs=[
            pl.BlockSpec((tm, two_co, two_ci), lambda m: (m, 0, 0)),
            pl.BlockSpec((tm, two_ci, B), lambda m: (m, 0, 0)),
        ],
        out_specs=pl.BlockSpec((tm, two_co, B), lambda m: (m, 0, 0)),
        compiler_params=pltpu.CompilerParams(
            dimension_semantics=("parallel",),
            vmem_limit_bytes=vmem_limit,
        ),
    )(w, x)

    out_r = jnp.transpose(out[:M, :Cout, :], (2, 1, 0))       # (B, Cout, M)
    out_i = jnp.transpose(out[:M, Cout:, :], (2, 1, 0))       # (B, Cout, M)
    return out_r, out_i


# ----------------------------------------------------------------------------
# Full forward pass.
# ----------------------------------------------------------------------------
def spectral_conv1d(x, w_real, w_imag, modes, *, prepared=None, force_path=None,
                    mxu_threshold=32, mxu_dtype=jnp.bfloat16):
    """SpectralConv1d forward (matches the PyTorch module).

    x:        (B, C_in, L) float32  (NCL layout, as in the PyTorch module)
    w_real:   (C_in, C_out, modes) float32
    w_imag:   (C_in, C_out, modes) float32
    prepared: optional PreparedSpectralWeights (caches the weight repack).
    returns   (B, C_out, L) float32
    """
    B, Cin, L = x.shape
    Cout = w_real.shape[1]
    n_freq = L // 2 + 1
    if modes > n_freq:
        raise ValueError(f"modes={modes} must be <= L//2+1={n_freq}")

    # TODO(synk): rfft/irfft have no Pallas primitive; computed in plain JAX.
    x_ft = jnp.fft.rfft(x, axis=-1)                            # (B, Cin, n_freq) c64
    xr = jnp.real(x_ft[:, :, :modes]).astype(jnp.float32)      # (B, Cin, M)
    xi = jnp.imag(x_ft[:, :, :modes]).astype(jnp.float32)

    if prepared is None:
        prepared = prepare_spectral_weights(
            w_real, w_imag, force_path=force_path,
            mxu_threshold=mxu_threshold, mxu_dtype=mxu_dtype)

    if prepared.path == "mxu":
        out_r, out_i = _mix_mxu(xr, xi, prepared.w)
    else:
        out_r, out_i = _mix_vpu(xr, xi, prepared.w)

    out_modes = jax.lax.complex(out_r, out_i)                  # (B, Cout, M)
    tail = jnp.zeros((B, Cout, n_freq - modes), dtype=out_modes.dtype)
    out_ft = jnp.concatenate([out_modes, tail], axis=-1)
    return jnp.fft.irfft(out_ft, n=L, axis=-1)


def _reference(x, w_real, w_imag, modes):
    """Pure-JAX reference mirroring the PyTorch module exactly."""
    B, Cin, L = x.shape
    Cout = w_real.shape[1]
    weights = (w_real + 1j * w_imag).astype(jnp.complex64)
    x_ft = jnp.fft.rfft(x, axis=-1)
    out_ft = jnp.zeros((B, Cout, L // 2 + 1), dtype=jnp.complex64)
    out_ft = out_ft.at[:, :, :modes].set(
        jnp.einsum("bix,iox->box", x_ft[:, :, :modes], weights)
    )
    return jnp.fft.irfft(out_ft, n=L, axis=-1)


if __name__ == "__main__":
    key = jax.random.PRNGKey(0)

    # --- Small config (config.width=4, config.modes=4) -> VPU lane=modes path.
    batch, width, modes, length = 2, 4, 4, 16
    key, kx, kwr, kwi = jax.random.split(key, 4)
    x = jax.random.normal(kx, (batch, width, length), dtype=jnp.float32)
    scale = 1.0 / (width * width)
    w_real = scale * jax.random.uniform(kwr, (width, width, modes), dtype=jnp.float32)
    w_imag = scale * jax.random.uniform(kwi, (width, width, modes), dtype=jnp.float32)

    ref = jax.block_until_ready(_reference(x, w_real, w_imag, modes))
    out = jax.block_until_ready(spectral_conv1d(x, w_real, w_imag, modes))
    assert out.shape == (batch, width, length), out.shape
    assert jnp.allclose(out, ref, atol=1e-5, rtol=1e-5), float(
        jnp.max(jnp.abs(out - ref)))

    # --- Wider config (width=32 >= threshold) -> MXU stacked-matmul path (bf16).
    batch2, width2, modes2, length2 = 2, 32, 8, 32
    key, kx2, kwr2, kwi2 = jax.random.split(key, 4)
    x2 = jax.random.normal(kx2, (batch2, width2, length2), dtype=jnp.float32)
    scale2 = 1.0 / (width2 * width2)
    w_real2 = scale2 * jax.random.uniform(kwr2, (width2, width2, modes2), dtype=jnp.float32)
    w_imag2 = scale2 * jax.random.uniform(kwi2, (width2, width2, modes2), dtype=jnp.float32)

    ref2 = jax.block_until_ready(_reference(x2, w_real2, w_imag2, modes2))
    out2 = jax.block_until_ready(spectral_conv1d(x2, w_real2, w_imag2, modes2))
    assert out2.shape == (batch2, width2, length2), out2.shape
    # bf16 MXU compute -> loosened tolerance (f32 accumulation, small channel sums).
    assert jnp.allclose(out2, ref2, atol=2e-3, rtol=2e-2), float(
        jnp.max(jnp.abs(out2 - ref2)))

    # Same config with the stacked weight prepared/cached once (hoisted repack).
    prepared = prepare_spectral_weights(w_real2, w_imag2)
    assert prepared.path == "mxu"
    out2p = jax.block_until_ready(
        spectral_conv1d(x2, w_real2, w_imag2, modes2, prepared=prepared))
    assert jnp.allclose(out2p, out2, atol=1e-6, rtol=1e-6), float(
        jnp.max(jnp.abs(out2p - out2)))

    print("KERNEL_OK")
</pallas_src>

<mosaic_0001>
module attributes {stable_mosaic.version = 11 : i64} {
  func.func @_vpu_mix_kernel(%arg0: i32, %arg1: memref<2x2x4x4xf32, #tpu.memory_space<vmem>>, %arg2: memref<2x4x4x4xf32, #tpu.memory_space<vmem>>, %arg3: memref<2x2x4x4xf32, #tpu.memory_space<vmem>>) attributes {dimension_semantics = [#tpu.dimension_semantics<parallel>], iteration_bounds = array<i64: 1>, scalar_prefetch = 0 : i64, scratch_operands = 0 : i64, tpu.core_type = #tpu.core_type<tc>, window_params = [{transform_indices = @transform_0, window_bounds = array<i64: 2, 2, 4, 4>}, {transform_indices = @transform_1, window_bounds = array<i64: 2, 4, 4, 4>}, {transform_indices = @transform_2, window_bounds = array<i64: 2, 2, 4, 4>}]} {
    %c0 = arith.constant 0 : index
    %c0_0 = arith.constant 0 : index
    %c0_1 = arith.constant 0 : index
    %c0_2 = arith.constant 0 : index
    %0 = vector.load %arg1[%c0, %c0_0, %c0_1, %c0_2] : memref<2x2x4x4xf32, #tpu.memory_space<vmem>>, vector<1x2x4x4xf32>
    %1 = vector.shape_cast %0 : vector<1x2x4x4xf32> to vector<2x4x4xf32>
    %c1 = arith.constant 1 : index
    %c0_3 = arith.constant 0 : index
    %c0_4 = arith.constant 0 : index
    %c0_5 = arith.constant 0 : index
    %2 = vector.load %arg1[%c1, %c0_3, %c0_4, %c0_5] : memref<2x2x4x4xf32, #tpu.memory_space<vmem>>, vector<1x2x4x4xf32>
    %3 = vector.shape_cast %2 : vector<1x2x4x4xf32> to vector<2x4x4xf32>
    %c0_6 = arith.constant 0 : index
    %c0_7 = arith.constant 0 : index
    %c0_8 = arith.constant 0 : index
    %c0_9 = arith.constant 0 : index
    %4 = vector.load %arg2[%c0_6, %c0_7, %c0_8, %c0_9] : memref<2x4x4x4xf32, #tpu.memory_space<vmem>>, vector<1x4x4x4xf32>
    %5 = vector.shape_cast %4 : vector<1x4x4x4xf32> to vector<4x4x4xf32>
    %c1_10 = arith.constant 1 : index
    %c0_11 = arith.constant 0 : index
    %c0_12 = arith.constant 0 : index
    %c0_13 = arith.constant 0 : index
    %6 = vector.load %arg2[%c1_10, %c0_11, %c0_12, %c0_13] : memref<2x4x4x4xf32, #tpu.memory_space<vmem>>, vector<1x4x4x4xf32>
    %7 = vector.shape_cast %6 : vector<1x4x4x4xf32> to vector<4x4x4xf32>
    %cst = arith.constant 0.000000e+00 : f32
    %8 = vector.broadcast %cst : f32 to vector<2x4x4xf32>
    %cst_14 = arith.constant 0.000000e+00 : f32
    %9 = vector.broadcast %cst_14 : f32 to vector<2x4x4xf32>
    %10 = vector.extract_strided_slice %1 {offsets = [0, 0, 0], sizes = [2, 1, 4], strides = [1, 1, 1]} : vector<2x4x4xf32> to vector<2x1x4xf32>
    %11 = vector.shape_cast %10 : vector<2x1x4xf32> to vector<2x4xf32>
    %12 = vector.shape_cast %11 : vector<2x4xf32> to vector<2x1x4xf32>
    %13 = vector.extract_strided_slice %3 {offsets = [0, 0, 0], sizes = [2, 1, 4], strides = [1, 1, 1]} : vector<2x4x4xf32> to vector<2x1x4xf32>
    %14 = vector.shape_cast %13 : vector<2x1x4xf32> to vector<2x4xf32>
    %15 = vector.shape_cast %14 : vector<2x4xf32> to vector<2x1x4xf32>
    %16 = vector.extract_strided_slice %5 {offsets = [0, 0, 0], sizes = [1, 4, 4], strides = [1, 1, 1]} : vector<4x4x4xf32> to vector<1x4x4xf32>
    %17 = vector.shape_cast %16 : vector<1x4x4xf32> to vector<4x4xf32>
    %18 = vector.shape_cast %17 : vector<4x4xf32> to vector<1x4x4xf32>
    %19 = vector.extract_strided_slice %7 {offsets = [0, 0, 0], sizes = [1, 4, 4], strides = [1, 1, 1]} : vector<4x4x4xf32> to vector<1x4x4xf32>
    %20 = vector.shape_cast %19 : vector<1x4x4xf32> to vector<4x4xf32>
    %21 = vector.shape_cast %20 : vector<4x4xf32> to vector<1x4x4xf32>
    %22 = vector.broadcast %12 : vector<2x1x4xf32> to vector<2x4x4xf32>
    %23 = vector.broadcast %18 : vector<1x4x4xf32> to vector<2x4x4xf32>
    %24 = arith.mulf %22, %23 : vector<2x4x4xf32>
    %25 = arith.addf %8, %24 : vector<2x4x4xf32>
    %26 = vector.broadcast %15 : vector<2x1x4xf32> to vector<2x4x4xf32>
    %27 = vector.broadcast %21 : vector<1x4x4xf32> to vector<2x4x4xf32>
    %28 = arith.mulf %26, %27 : vector<2x4x4xf32>
    %29 = arith.subf %25, %28 : vector<2x4x4xf32>
    %30 = vector.broadcast %12 : vector<2x1x4xf32> to vector<2x4x4xf32>
    %31 = vector.broadcast %21 : vector<1x4x4xf32> to vector<2x4x4xf32>
    %32 = arith.mulf %30, %31 : vector<2x4x4xf32>
    %33 = arith.addf %9, %32 : vector<2x4x4xf32>
    %34 = vector.broadcast %15 : vector<2x1x4xf32> to vector<2x4x4xf32>
    %35 = vector.broadcast %18 : vector<1x4x4xf32> to vector<2x4x4xf32>
    %36 = arith.mulf %34, %35 : vector<2x4x4xf32>
    %37 = arith.addf %33, %36 : vector<2x4x4xf32>
    %38 = vector.extract_strided_slice %1 {offsets = [0, 1, 0], sizes = [2, 1, 4], strides = [1, 1, 1]} : vector<2x4x4xf32> to vector<2x1x4xf32>
    %39 = vector.shape_cast %38 : vector<2x1x4xf32> to vector<2x4xf32>
    %40 = vector.shape_cast %39 : vector<2x4xf32> to vector<2x1x4xf32>
    %41 = vector.extract_strided_slice %3 {offsets = [0, 1, 0], sizes = [2, 1, 4], strides = [1, 1, 1]} : vector<2x4x4xf32> to vector<2x1x4xf32>
    %42 = vector.shape_cast %41 : vector<2x1x4xf32> to vector<2x4xf32>
    %43 = vector.shape_cast %42 : vector<2x4xf32> to vector<2x1x4xf32>
    %44 = vector.extract_strided_slice %5 {offsets = [1, 0, 0], sizes = [1, 4, 4], strides = [1, 1, 1]} : vector<4x4x4xf32> to vector<1x4x4xf32>
    %45 = vector.shape_cast %44 : vector<1x4x4xf32> to vector<4x4xf32>
    %46 = vector.shape_cast %45 : vector<4x4xf32> to vector<1x4x4xf32>
    %47 = vector.extract_strided_slice %7 {offsets = [1, 0, 0], sizes = [1, 4, 4], strides = [1, 1, 1]} : vector<4x4x4xf32> to vector<1x4x4xf32>
    %48 = vector.shape_cast %47 : vector<1x4x4xf32> to vector<4x4xf32>
    %49 = vector.shape_cast %48 : vector<4x4xf32> to vector<1x4x4xf32>
    %50 = vector.broadcast %40 : vector<2x1x4xf32> to vector<2x4x4xf32>
    %51 = vector.broadcast %46 : vector<1x4x4xf32> to vector<2x4x4xf32>
    %52 = arith.mulf %50, %51 : vector<2x4x4xf32>
    %53 = arith.addf %29, %52 : vector<2x4x4xf32>
    %54 = vector.broadcast %43 : vector<2x1x4xf32> to vector<2x4x4xf32>
    %55 = vector.broadcast %49 : vector<1x4x4xf32> to vector<2x4x4xf32>
    %56 = arith.mulf %54, %55 : vector<2x4x4xf32>
    %57 = arith.subf %53, %56 : vector<2x4x4xf32>
    %58 = vector.broadcast %40 : vector<2x1x4xf32> to vector<2x4x4xf32>
    %59 = vector.broadcast %49 : vector<1x4x4xf32> to vector<2x4x4xf32>
    %60 = arith.mulf %58, %59 : vector<2x4x4xf32>
    %61 = arith.addf %37, %60 : vector<2x4x4xf32>
    %62 = vector.broadcast %43 : vector<2x1x4xf32> to vector<2x4x4xf32>
    %63 = vector.broadcast %46 : vector<1x4x4xf32> to vector<2x4x4xf32>
    %64 = arith.mulf %62, %63 : vector<2x4x4xf32>
    %65 = arith.addf %61, %64 : vector<2x4x4xf32>
    %66 = vector.extract_strided_slice %1 {offsets = [0, 2, 0], sizes = [2, 1, 4], strides = [1, 1, 1]} : vector<2x4x4xf32> to vector<2x1x4xf32>
    %67 = vector.shape_cast %66 : vector<2x1x4xf32> to vector<2x4xf32>
    %68 = vector.shape_cast %67 : vector<2x4xf32> to vector<2x1x4xf32>
    %69 = vector.extract_strided_slice %3 {offsets = [0, 2, 0], sizes = [2, 1, 4], strides = [1, 1, 1]} : vector<2x4x4xf32> to vector<2x1x4xf32>
    %70 = vector.shape_cast %69 : vector<2x1x4xf32> to vector<2x4xf32>
    %71 = vector.shape_cast %70 : vector<2x4xf32> to vector<2x1x4xf32>
    %72 = vector.extract_strided_slice %5 {offsets = [2, 0, 0], sizes = [1, 4, 4], strides = [1, 1, 1]} : vector<4x4x4xf32> to vector<1x4x4xf32>
    %73 = vector.shape_cast %72 : vector<1x4x4xf32> to vector<4x4xf32>
    %74 = vector.shape_cast %73 : vector<4x4xf32> to vector<1x4x4xf32>
    %75 = vector.extract_strided_slice %7 {offsets = [2, 0, 0], sizes = [1, 4, 4], strides = [1, 1, 1]} : vector<4x4x4xf32> to vector<1x4x4xf32>
    %76 = vector.shape_cast %75 : vector<1x4x4xf32> to vector<4x4xf32>
    %77 = vector.shape_cast %76 : vector<4x4xf32> to vector<1x4x4xf32>
    %78 = vector.broadcast %68 : vector<2x1x4xf32> to vector<2x4x4xf32>
    %79 = vector.broadcast %74 : vector<1x4x4xf32> to vector<2x4x4xf32>
    %80 = arith.mulf %78, %79 : vector<2x4x4xf32>
    %81 = arith.addf %57, %80 : vector<2x4x4xf32>
    %82 = vector.broadcast %71 : vector<2x1x4xf32> to vector<2x4x4xf32>
    %83 = vector.broadcast %77 : vector<1x4x4xf32> to vector<2x4x4xf32>
    %84 = arith.mulf %82, %83 : vector<2x4x4xf32>
    %85 = arith.subf %81, %84 : vector<2x4x4xf32>
    %86 = vector.broadcast %68 : vector<2x1x4xf32> to vector<2x4x4xf32>
    %87 = vector.broadcast %77 : vector<1x4x4xf32> to vector<2x4x4xf32>
    %88 = arith.mulf %86, %87 : vector<2x4x4xf32>
    %89 = arith.addf %65, %88 : vector<2x4x4xf32>
    %90 = vector.broadcast %71 : vector<2x1x4xf32> to vector<2x4x4xf32>
    %91 = vector.broadcast %74 : vector<1x4x4xf32> to vector<2x4x4xf32>
    %92 = arith.mulf %90, %91 : vector<2x4x4xf32>
    %93 = arith.addf %89, %92 : vector<2x4x4xf32>
    %94 = vector.extract_strided_slice %1 {offsets = [0, 3, 0], sizes = [2, 1, 4], strides = [1, 1, 1]} : vector<2x4x4xf32> to vector<2x1x4xf32>
    %95 = vector.shape_cast %94 : vector<2x1x4xf32> to vector<2x4xf32>
    %96 = vector.shape_cast %95 : vector<2x4xf32> to vector<2x1x4xf32>
    %97 = vector.extract_strided_slice %3 {offsets = [0, 3, 0], sizes = [2, 1, 4], strides = [1, 1, 1]} : vector<2x4x4xf32> to vector<2x1x4xf32>
    %98 = vector.shape_cast %97 : vector<2x1x4xf32> to vector<2x4xf32>
    %99 = vector.shape_cast %98 : vector<2x4xf32> to vector<2x1x4xf32>
    %100 = vector.extract_strided_slice %5 {offsets = [3, 0, 0], sizes = [1, 4, 4], strides = [1, 1, 1]} : vector<4x4x4xf32> to vector<1x4x4xf32>
    %101 = vector.shape_cast %100 : vector<1x4x4xf32> to vector<4x4xf32>
    %102 = vector.shape_cast %101 : vector<4x4xf32> to vector<1x4x4xf32>
    %103 = vector.extract_strided_slice %7 {offsets = [3, 0, 0], sizes = [1, 4, 4], strides = [1, 1, 1]} : vector<4x4x4xf32> to vector<1x4x4xf32>
    %104 = vector.shape_cast %103 : vector<1x4x4xf32> to vector<4x4xf32>
    %105 = vector.shape_cast %104 : vector<4x4xf32> to vector<1x4x4xf32>
    %106 = vector.broadcast %96 : vector<2x1x4xf32> to vector<2x4x4xf32>
    %107 = vector.broadcast %102 : vector<1x4x4xf32> to vector<2x4x4xf32>
    %108 = arith.mulf %106, %107 : vector<2x4x4xf32>
    %109 = arith.addf %85, %108 : vector<2x4x4xf32>
    %110 = vector.broadcast %99 : vector<2x1x4xf32> to vector<2x4x4xf32>
    %111 = vector.broadcast %105 : vector<1x4x4xf32> to vector<2x4x4xf32>
    %112 = arith.mulf %110, %111 : vector<2x4x4xf32>
    %113 = arith.subf %109, %112 : vector<2x4x4xf32>
    %114 = vector.broadcast %96 : vector<2x1x4xf32> to vector<2x4x4xf32>
    %115 = vector.broadcast %105 : vector<1x4x4xf32> to vector<2x4x4xf32>
    %116 = arith.mulf %114, %115 : vector<2x4x4xf32>
    %117 = arith.addf %93, %116 : vector<2x4x4xf32>
    %118 = vector.broadcast %99 : vector<2x1x4xf32> to vector<2x4x4xf32>
    %119 = vector.broadcast %102 : vector<1x4x4xf32> to vector<2x4x4xf32>
    %120 = arith.mulf %118, %119 : vector<2x4x4xf32>
    %121 = arith.addf %117, %120 : vector<2x4x4xf32>
    %c0_15 = arith.constant 0 : index
    %c0_16 = arith.constant 0 : index
    %c0_17 = arith.constant 0 : index
    %c0_18 = arith.constant 0 : index
    %122 = vector.load %arg3[%c0_15, %c0_16, %c0_17, %c0_18] : memref<2x2x4x4xf32, #tpu.memory_space<vmem>>, vector<1x2x4x4xf32>
    %123 = vector.shape_cast %122 : vector<1x2x4x4xf32> to vector<2x4x4xf32>
    %124 = vector.shape_cast %113 : vector<2x4x4xf32> to vector<1x2x4x4xf32>
    tpu.vector_store %arg3[%c0_15, %c0_16, %c0_17, %c0_18], %124 {strides = array<i32>} : memref<2x2x4x4xf32, #tpu.memory_space<vmem>>, vector<1x2x4x4xf32>,
    %c1_19 = arith.constant 1 : index
    %c0_20 = arith.constant 0 : index
    %c0_21 = arith.constant 0 : index
    %c0_22 = arith.constant 0 : index
    %125 = vector.load %arg3[%c1_19, %c0_20, %c0_21, %c0_22] : memref<2x2x4x4xf32, #tpu.memory_space<vmem>>, vector<1x2x4x4xf32>
    %126 = vector.shape_cast %125 : vector<1x2x4x4xf32> to vector<2x4x4xf32>
    %127 = vector.shape_cast %121 : vector<2x4x4xf32> to vector<1x2x4x4xf32>
    tpu.vector_store %arg3[%c1_19, %c0_20, %c0_21, %c0_22], %127 {strides = array<i32>} : memref<2x2x4x4xf32, #tpu.memory_space<vmem>>, vector<1x2x4x4xf32>,
    return
  }
  func.func @transform_0(%arg0: i32) -> (i32, i32, i32, i32) {
    %c0_i32 = arith.constant 0 : i32
    %c0_i32_0 = arith.constant 0 : i32
    %c0_i32_1 = arith.constant 0 : i32
    %c0_i32_2 = arith.constant 0 : i32
    return %c0_i32, %c0_i32_0, %c0_i32_1, %arg0 : i32, i32, i32, i32
  }
  func.func @transform_1(%arg0: i32) -> (i32, i32, i32, i32) {
    %c0_i32 = arith.constant 0 : i32
    %c0_i32_0 = arith.constant 0 : i32
    %c0_i32_1 = arith.constant 0 : i32
    %c0_i32_2 = arith.constant 0 : i32
    return %c0_i32, %c0_i32_0, %c0_i32_1, %arg0 : i32, i32, i32, i32
  }
  func.func @transform_2(%arg0: i32) -> (i32, i32, i32, i32) {
    %c0_i32 = arith.constant 0 : i32
    %c0_i32_0 = arith.constant 0 : i32
    %c0_i32_1 = arith.constant 0 : i32
    %c0_i32_2 = arith.constant 0 : i32
    return %c0_i32, %c0_i32_0, %c0_i32_1, %arg0 : i32, i32, i32, i32
  }
}

</mosaic_0001>

<bundles_post_ra>
// kernel: tpu_custom_call.1
= control target key start
LH: loop header
LB: loop body
LE: loop exit
PB: predicated region body
PF: predicated region fallthrough
CT: control target
= control target key end

     0   :  { %7 = vsyncpa [#allocation3], 0  ;;  %s325_s0 = inlined_call_operand.hbm [shape: f32[2,2,4,4], index: 0, kind: input, shape index: {}]   ;;  %s326_s1 = inlined_call_operand.hbm [shape: f32[2,4,4,4], index: 1, kind: input, shape index: {}]   ;;  %s327_s2 = inlined_call_operand.hbm [shape: f32[2,2,4,4], index: 2, kind: output, shape index: {}]  }
   0x1   :  { %8 = vsyncpa [#allocation6], 0 }
   0x2   :  { %9 = vsyncpa [#allocation4], 0  ;;  %s14_s11 = sshll.u32 %s325_s0, 4  ;;  %s247_s12 = smov [#allocation2]   ;;  %s15_s11 = int_to_ptr.hbm [resolvable:$true] %s14_s11 }
   0x3   :  { %s16_s13 = sshll.u32 %s247_s12, 4  ;;  %s27_s16 = sshll.u32 %s326_s1, 4  ;;  %s17_s13 = int_to_ptr.vmem [resolvable:$true] %s16_s13  ;;  %s28_s16 = int_to_ptr.hbm [resolvable:$true] %s27_s16 }
   0x4   :  { %s248_s17 = smov 64   ;;  %s249_s18 = smov 4  }
   0x5   :  { %22 = dma.hbm_to_vmem [thread:$0]  %s15_s11, 256, %s17_s13, [#allocation3], %s248_s17, %s248_s17, %s249_s18  }
   0x6   :  { %s250_s19 = smov [#allocation5]  }
   0x7   :  { %s29_s20 = sshll.u32 %s250_s19, 4  ;;  %s30_s20 = int_to_ptr.vmem [resolvable:$true] %s29_s20 }
   0x8   :  { %35 = dma.hbm_to_vmem [thread:$0]  %s28_s16, 512, %s30_s20, [#allocation6], %s248_s17, %s248_s17, %s249_s18  }
   0x9   :  { %241 = dma.done.wait [#allocation3], 256  }
   0xa   :  { %242 = vsyncadd [#allocation3], 4294967040 }
   0xb   :  { %243 = dma.done.wait [#allocation6], 512  }
   0xc   :  { %244 = vsyncadd [#allocation6], 4294966784  ;;  %v279_v0 = vld [vmem:[#allocation2] sm:$0xf]  ;;  %v281_v1 = vld [vmem:[#allocation2 + $0x8] sm:$0xf] }
   0xd   :  { %v49_v2 = vld [vmem:[#allocation5] sm:$0xf]  ;;  %v50_v3 = vld [vmem:[#allocation5 + $0x4] sm:$0xf]  ;;  %v54_v4 = vld [vmem:[#allocation5 + $0x10] sm:$0xf] }
   0xe   :  { %v58_v5 = vperm.slane %v279_v0, 0  ;;  %v64_v6 = vperm.slane %v281_v1, 0  ;;  %v78_v7 = vperm.slane %v279_v0, 1  ;;  %v84_v8 = vperm.slane %v281_v1, 1  ;;  %v288_v10 = vld [vmem:[#allocation2 + $0x4] sm:$0xf] }
   0xf   :  { %v98_v9 = vperm.slane %v279_v0, 2  ;;  %v290_v11 = vld [vmem:[#allocation5 + $0x8] sm:$0xf]  ;;  %v55_v12 = vld [vmem:[#allocation5 + $0x14] sm:$0xf]  ;;  %v104_v18 = vperm.slane %v281_v1, 2 }
  0x10   :  { %v60_v13 = vmul.f32 %v58_v5, %v49_v2  ;;  %v66_v14 = vmul.f32 %v64_v6, %v54_v4  ;;  %v80_v15 = vmul.f32 %v78_v7, %v50_v3  ;;  %v292_v16 = vld [vmem:[#allocation2 + $0xc] sm:$0xf]  ;;  %v86_v17 = vmul.f32 %v84_v8, %v55_v12  ;;  %v297_v21 = vld [vmem:[#allocation5 + $0xc] sm:$0xf]  ;;  %v56_v30 = vld [vmem:[#allocation5 + $0x18] sm:$0xf] }
  0x11   :  { %v118_v19 = vperm.slane %v279_v0, 3  ;;  %v124_v20 = vperm.slane %v281_v1, 3  ;;  %v59_v23 = vperm.slane %v288_v10, 0  ;;  %v65_v24 = vperm.slane %v292_v16, 0  ;;  %v57_v37 = vld [vmem:[#allocation5 + $0x1c] sm:$0xf] }
  0x12   :  { %v68_v22 = vsub.f32 %v60_v13, %v66_v14  ;;  %v79_v25 = vperm.slane %v288_v10, 1  ;;  %v100_v26 = vmul.f32 %v98_v9, %v290_v11  ;;  %v85_v27 = vperm.slane %v292_v16, 1  ;;  %s251_s0 = smov [#allocation7]   ;;  %s150_s23 = sshll.u32 %s327_s2, 4  ;;  %s151_s23 = int_to_ptr.hbm [resolvable:$true] %s150_s23 }
  0x13   :  { %v99_v28 = vperm.slane %v288_v10, 2  ;;  %v105_v29 = vperm.slane %v292_v16, 2  ;;  %v61_v32 = vmul.f32 %v59_v23, %v49_v2  ;;  %v67_v33 = vmul.f32 %v65_v24, %v54_v4  ;;  %s148_s1 = sshll.u32 %s251_s0, 4  ;;  %s149_s1 = int_to_ptr.vmem [resolvable:$true] %s148_s1 }
  0x14   :  { %v82_v31 = vadd.f32 %v80_v15, %v68_v22  ;;  %v81_v34 = vmul.f32 %v79_v25, %v50_v3  ;;  %v106_v35 = vmul.f32 %v104_v18, %v56_v30  ;;  %v120_v36 = vmul.f32 %v118_v19, %v297_v21 }
  0x15   :  { %v69_v39 = vsub.f32 %v61_v32, %v67_v33  ;;  %v87_v40 = vmul.f32 %v85_v27, %v55_v12  ;;  %v70_v41 = vmul.f32 %v58_v5, %v54_v4  ;;  %v126_v42 = vmul.f32 %v124_v20, %v57_v37 }
  0x16   :  { %v88_v38 = vsub.f32 %v82_v31, %v86_v17  ;;  %v119_v43 = vperm.slane %v288_v10, 3  ;;  %v74_v44 = vmul.f32 %v64_v6, %v49_v2  ;;  %v90_v45 = vmul.f32 %v78_v7, %v55_v12 }
  0x17   :  { %v83_v47 = vadd.f32 %v81_v34, %v69_v39  ;;  %v101_v48 = vmul.f32 %v99_v28, %v290_v11  ;;  %v107_v49 = vmul.f32 %v105_v29, %v56_v30  ;;  %v125_v50 = vperm.slane %v292_v16, 3 }
  0x18   :  { %v102_v46 = vadd.f32 %v100_v26, %v88_v38  ;;  %v76_v51 = vadd.f32 %v74_v44, %v70_v41  ;;  %v94_v52 = vmul.f32 %v84_v8, %v50_v3  ;;  %v71_v53 = vmul.f32 %v59_v23, %v54_v4 }
  0x19   :  { %v89_v55 = vsub.f32 %v83_v47, %v87_v40  ;;  %v75_v56 = vmul.f32 %v65_v24, %v49_v2  ;;  %v91_v57 = vmul.f32 %v79_v25, %v55_v12  ;;  %v121_v58 = vmul.f32 %v119_v43, %v297_v21 }
  0x1a   :  { %v108_v54 = vsub.f32 %v102_v46, %v106_v35  ;;  %v92_v59 = vadd.f32 %v90_v45, %v76_v51  ;;  %v110_v60 = vmul.f32 %v98_v9, %v56_v30  ;;  %v95_v0 = vmul.f32 %v85_v27, %v50_v3 }
  0x1b   :  { %v103_v62 = vadd.f32 %v101_v48, %v89_v55  ;;  %v77_v63 = vadd.f32 %v75_v56, %v71_v53  ;;  %vm138_vm0 = vcmask 27648   ;;  %v127_v1 = vmul.f32 %v125_v50, %v57_v37 }
  0x1c   :  { %v122_v61 = vadd.f32 %v120_v36, %v108_v54  ;;  %v96_v5 = vadd.f32 %v94_v52, %v92_v59  ;;  %v114_v6 = vmul.f32 %v104_v18, %v290_v11  ;;  %v111_v10 = vmul.f32 %v99_v28, %v56_v30 }
  0x1d   :  { %v109_v8 = vsub.f32 %v103_v62, %v107_v49  ;;  %v93_v4 = vadd.f32 %v91_v57, %v77_v63  ;;  %v130_v2 = vmul.f32 %v118_v19, %v57_v37  ;;  %v115_v9 = vmul.f32 %v105_v29, %v290_v11 }
  0x1e   :  { %v128_v7 = vsub.f32 %v122_v61, %v126_v42  ;;  %v112_v13 = vadd.f32 %v110_v60, %v96_v5  ;;  %v134_v3 = vmul.f32 %v124_v20, %v297_v21  ;;  %v131_v22 = vmul.f32 %v119_v43, %v57_v37 }
  0x1f   :  { %v123_v12 = vadd.f32 %v121_v58, %v109_v8  ;;  %v97_v14 = vadd.f32 %v95_v0, %v93_v4  ;;  %v135_v24 = vmul.f32 %v125_v50, %v297_v21 }
  0x20   :  { %139 = vst.msk [vmem:[#allocation7] sm:$0xf] %vm138_vm0, %v128_v7  ;;  %v116_v15 = vadd.f32 %v114_v6, %v112_v13 }
  0x21   :  { %v129_v16 = vsub.f32 %v123_v12, %v127_v1  ;;  %v113_v17 = vadd.f32 %v111_v10, %v97_v14 }
  0x22   :  { %v132_v23 = vadd.f32 %v130_v2, %v116_v15 }
  0x23   :  { %140 = vst.msk [vmem:[#allocation7 + $0x4] sm:$0xf] %vm138_vm0, %v129_v16  ;;  %v117_v18 = vadd.f32 %v115_v9, %v113_v17 }
  0x24   :  { %v136_v25 = vadd.f32 %v134_v3, %v132_v23 }
  0x25   :  { %v133_v11 = vadd.f32 %v131_v22, %v117_v18 }
  0x26   :  { %142 = vst.msk [vmem:[#allocation7 + $0x8] sm:$0xf] %vm138_vm0, %v136_v25 }
  0x27   :  { %v137_v19 = vadd.f32 %v135_v24, %v133_v11 }
  0x29   :  { %143 = vst.msk [vmem:[#allocation7 + $0xc] sm:$0xf] %vm138_vm0, %v137_v19 }
  0x2a   :  { %156 = dma.vmem_to_hbm [thread:$0]  %s149_s1, 256, %s151_s23, [#allocation4], %s248_s17, %s248_s17, %s249_s18  }
  0x2b   :  { %245 = dma.done.wait [#allocation4], 256  }
  0x2c   :  { %246 = vsyncadd [#allocation4], 4294967040 }
  0x2d   :  { %161 = vsyncpa [#allocation3], 1 }
  0x2e   :  { %162 = vsyncpa [#allocation6], 1 }
  0x2f   :  { %163 = vsyncpa [#allocation4], 1 }

</bundles_post_ra>
